<compile_context>
chip_gen: v5e
topology: v5e:2x2
jax: 0.10.0
libtpu: 0.0.40
codegen_flags: <defaults>
</compile_context>

<pallas_src>
import jax
import jax.numpy as jnp
from jax.experimental import pallas as pl
from jax.experimental.pallas import tpu as pltpu


def _dma_copy_kernel(a_ref, o_ref, sem):
    # Single HBM->HBM DMA of the whole array: no VMEM staging, no grid, no vld/vst work.
    cp = pltpu.make_async_copy(a_ref, o_ref, sem)
    cp.start()
    cp.wait()


def _materialize_copy(a):
    """Bit-exact copy of `a` into a fresh HBM buffer via one DMA descriptor."""
    return pl.pallas_call(
        _dma_copy_kernel,
        out_shape=jax.ShapeDtypeStruct(a.shape, a.dtype),
        in_specs=[pl.BlockSpec(memory_space=pl.ANY)],
        out_specs=pl.BlockSpec(memory_space=pl.ANY),
        scratch_shapes=[pltpu.SemaphoreType.DMA(())],
        compiler_params=pltpu.CompilerParams(has_side_effects=True),
    )(a)


def wrapper_forward(a, x=None, *, materialize=True):
    """Reproduces wrapper.forward(a, x) == a.

    `x` is ignored (the wrapped score module's identity path does not use it).
    With materialize=False this is the roofline-optimal implementation: return `a`
    with zero HBM traffic.  With materialize=True a single HBM->HBM DMA kernel copies
    `a` into a fresh output buffer (used here so a Pallas kernel actually executes).
    """
    del x  # unused by the forward pass; never staged or transferred
    if not materialize or a.size == 0:
        return a
    return _materialize_copy(a)


if __name__ == "__main__":
    key = jax.random.PRNGKey(0)
    ka, kx = jax.random.split(key)
    # Small shapes consistent with a generic (batch, channels, H, W) style input.
    a = jax.random.normal(ka, (2, 4, 16, 16), dtype=jnp.float32)
    x = jax.random.normal(kx, (2, 4, 16, 16), dtype=jnp.float32)

    # Run the Pallas kernel path once (single HBM->HBM DMA copy).
    out = wrapper_forward(a, x, materialize=True)
    jax.block_until_ready(out)

    assert out.shape == a.shape and out.dtype == a.dtype
    assert bool(jnp.all(out == a))

    # Zero-traffic identity path (the recommended production path).
    out_fast = wrapper_forward(a, x, materialize=False)
    jax.block_until_ready(out_fast)
    assert bool(jnp.all(out_fast == a))

    print("KERNEL_OK")
</pallas_src>

<mosaic_0001>
module attributes {stable_mosaic.version = 11 : i64} {
  func.func @_dma_copy_kernel(%arg0: memref<2x4x16x16xf32, #tpu.memory_space<any>>, %arg1: memref<2x4x16x16xf32, #tpu.memory_space<any>>, %arg2: memref<!tpu.dma_semaphore, #tpu.memory_space<semaphore_mem>>) attributes {dimension_semantics = [], scalar_prefetch = 0 : i64, scratch_operands = 1 : i64, tpu.core_type = #tpu.core_type<tc>} {
    tpu.enqueue_dma source(%arg0 : memref<2x4x16x16xf32, #tpu.memory_space<any>>) target(%arg1 : memref<2x4x16x16xf32, #tpu.memory_space<any>>) target_semaphore(%arg2 : memref<!tpu.dma_semaphore, #tpu.memory_space<semaphore_mem>>)
    tpu.wait_dma2 semaphore(%arg2 : memref<!tpu.dma_semaphore, #tpu.memory_space<semaphore_mem>>) src(%arg0 : memref<2x4x16x16xf32, #tpu.memory_space<any>>) dst(%arg1 : memref<2x4x16x16xf32, #tpu.memory_space<any>>)
    return
  }
}

</mosaic_0001>

<bundles_post_ra>
// kernel: tpu_custom_call.1
= control target key start
LH: loop header
LB: loop body
LE: loop exit
PB: predicated region body
PF: predicated region fallthrough
CT: control target
= control target key end

     0   :  { %s34_s12 = smov [#allocation2]   ;;  %s35_s13 = smov [#allocation3]   ;;  %s53_s0 = inlined_call_operand.hbm [shape: f32[2,4,16,16], index: 0, kind: input, shape index: {}]   ;;  %s54_s1 = inlined_call_operand.hbm [shape: f32[2,4,16,16], index: 1, kind: output, shape index: {}]  }
   0x1   :  { %s10_s8 = sshll.u32 %s53_s0, 4  ;;  %s12_s11 = sshll.u32 %s54_s1, 4  ;;  %s11_s8 = int_to_ptr.hbm [resolvable:$true] %s10_s8  ;;  %s13_s11 = int_to_ptr.hbm [resolvable:$true] %s12_s11 }
   0x2   :  { %s36_s14 = smov 0  }
   0x3   :  { %16 = dma.general %s11_s8, 2048, %s13_s11, %s34_s12, %s35_s13, [#allocation4], %s36_s14, 0  }
   0x4   :  { %32 = dma.done.wait [#allocation2], 2048 }
   0x5   :  { %33 = vsyncadd [#allocation2], 4294965248 }
   0x6   :  { %22 = vsyncmov [#allocation2] }
   0x9   :  { %s23_s15 = vpop.sfrf %22 }
   0xa   :  { %p28_p0 = scmp.ne.s32.totalorder %s23_s15, 0 }
   0xc   :  { %27 = shalt.err (%p28_p0)  }

</bundles_post_ra>
